<compile_context>
chip_gen: v5e
topology: v5e:2x2
jax: 0.10.0
libtpu: 0.0.40
codegen_flags: <defaults>
</compile_context>

<pallas_src>
import functools

import jax
import jax.numpy as jnp
from jax import lax
from jax.experimental import pallas as pl
from jax.experimental.pallas import tpu as pltpu

BN_EPS = 1e-5
VMEM_LIMIT = 32 * 1024 * 1024       # safe scoped-VMEM request on v5e/v6e/v7x


# ---------------------------------------------------------------------------
# Pallas kernels
# ---------------------------------------------------------------------------
def _conv_stats_kernel(*refs, ksize, stride, h_out, w_out, n_phases):
    """One image: direct conv (k*k shifted matmuls per output row) + BN partials.

    refs = (x_phase_0, ..., x_phase_{n_phases-1}, w, y, sum, sumsq)
      x_phase_p : (Hp, Wph, Cin)   bf16  padded activation, W-phase p
      w         : (k*k, Cin, Cout) bf16  per-tap weight matrices
      y         : (Ho, Wo, Cout)   bf16  raw conv product (written)
      sum/sumsq : (1, Cout)        f32   per-image per-channel stat partials
    """
    x_refs = refs[:n_phases]
    w_ref = refs[n_phases]
    y_ref, sum_ref, sq_ref = refs[n_phases + 1:]
    cout = w_ref.shape[-1]

    sum_ref[...] = jnp.zeros_like(sum_ref)
    sq_ref[...] = jnp.zeros_like(sq_ref)

    def row_body(h, carry):
        acc = jnp.zeros((w_out, cout), jnp.float32)
        for kh in range(ksize):                 # static tap loop (<= 9 taps)
            for kw in range(ksize):
                ph, c0 = kw % stride, kw // stride
                # contiguous (Wo, Cin) slab: column (c0+w)*stride+ph == w*stride+kw
                xs = x_refs[ph][h * stride + kh, c0:c0 + w_out, :]
                acc = acc + jnp.dot(xs, w_ref[kh * ksize + kw],
                                    preferred_element_type=jnp.float32)
        y_ref[h] = acc.astype(y_ref.dtype)
        sum_ref[...] += jnp.sum(acc, axis=0, keepdims=True)
        sq_ref[...] += jnp.sum(acc * acc, axis=0, keepdims=True)
        return carry

    lax.fori_loop(0, h_out, row_body, 0)


def _bn_affine_kernel(*refs, has_residual, apply_relu):
    """One image: y*scale + shift (+ residual) (+ ReLU) -> bf16 (f32 math)."""
    if has_residual:
        y_ref, scale_ref, shift_ref, res_ref, out_ref = refs
    else:
        y_ref, scale_ref, shift_ref, out_ref = refs
    v = y_ref[...].astype(jnp.float32) * scale_ref[...] + shift_ref[...]
    if has_residual:
        v = v + res_ref[...].astype(jnp.float32)
    if apply_relu:
        v = jnp.maximum(v, 0.0)
    out_ref[...] = v.astype(out_ref.dtype)


# ---------------------------------------------------------------------------
# Fused Conv2d(bias=False) + BatchNorm2d (+ residual) (+ ReLU)
# ---------------------------------------------------------------------------
def conv2d_bn(x, w_oihw, gamma, beta, *, stride=1, padding=0,
              residual=None, apply_relu=False):
    """x: (N,H,W,Cin) bf16 NHWC; w: torch (Cout,Cin,k,k). Returns bf16 NHWC."""
    N, H, W, cin = x.shape
    cout, _, ksize, _ = w_oihw.shape
    h_out = (H + 2 * padding - ksize) // stride + 1
    w_out = (W + 2 * padding - ksize) // stride + 1

    xp = x
    if padding:
        xp = jnp.pad(xp, ((0, 0), (padding, padding), (padding, padding), (0, 0)))
    s_eff = stride
    if ksize == 1 and stride > 1:
        # 1x1 strided conv == 1x1 conv on the subsampled input.
        xp = xp[:, ::stride, ::stride, :]
        s_eff = 1
    # W-phase views so every in-kernel column slice is contiguous (no strided ds).
    if s_eff == 1:
        phases = [xp.astype(jnp.bfloat16)]
    else:
        phases = [xp[:, :, p::s_eff, :].astype(jnp.bfloat16) for p in range(s_eff)]
    # sanity: every tap's row/column window fits its phase
    for kw in range(ksize):
        assert kw // s_eff + w_out <= phases[kw % s_eff].shape[2]
    assert (h_out - 1) * s_eff + ksize <= phases[0].shape[1]

    # torch (Cout, Cin, kh, kw) -> (kh*kw, Cin, Cout), matching tap order.
    w = jnp.transpose(w_oihw, (2, 3, 1, 0)).reshape(ksize * ksize, cin, cout)
    w = w.astype(jnp.bfloat16)

    cparams = pltpu.CompilerParams(
        dimension_semantics=("parallel",),     # independent images; shards
        vmem_limit_bytes=VMEM_LIMIT)           #   across v7x's 2 TensorCores

    # ---- pass 1: direct conv -> y (bf16) + per-image batch-stat partials ----
    kernel1 = functools.partial(
        _conv_stats_kernel, ksize=ksize, stride=s_eff,
        h_out=h_out, w_out=w_out, n_phases=len(phases))
    in_specs = [pl.BlockSpec((pl.Squeezed(),) + p.shape[1:],
                             lambda n: (n, 0, 0, 0)) for p in phases]
    in_specs.append(pl.BlockSpec(w.shape, lambda n: (0, 0, 0)))
    flops = 2 * N * h_out * w_out * ksize * ksize * cin * cout
    bytes_acc = (sum(p.size for p in phases) * 2 + w.size * 2
                 + N * h_out * w_out * cout * 2 + 2 * N * cout * 4)
    y, s_sum, s_sq = pl.pallas_call(
        kernel1,
        grid=(N,),
        in_specs=in_specs,
        out_specs=[
            pl.BlockSpec((pl.Squeezed(), h_out, w_out, cout), lambda n: (n, 0, 0, 0)),
            pl.BlockSpec((pl.Squeezed(), 1, cout), lambda n: (n, 0, 0)),
            pl.BlockSpec((pl.Squeezed(), 1, cout), lambda n: (n, 0, 0)),
        ],
        out_shape=[
            jax.ShapeDtypeStruct((N, h_out, w_out, cout), jnp.bfloat16),
            jax.ShapeDtypeStruct((N, 1, cout), jnp.float32),
            jax.ShapeDtypeStruct((N, 1, cout), jnp.float32),
        ],
        compiler_params=cparams,
        cost_estimate=pl.CostEstimate(flops=flops, transcendentals=0,
                                      bytes_accessed=bytes_acc),
    )(*phases, w)

    # ---- hoisted BN affine parameters (tiny, plain JAX) --------------------
    m_total = N * h_out * w_out
    mean = jnp.sum(s_sum, axis=0).reshape(-1) / m_total
    var = jnp.maximum(jnp.sum(s_sq, axis=0).reshape(-1) / m_total - mean * mean, 0.0)
    inv_std = lax.rsqrt(var + BN_EPS)
    g = gamma.astype(jnp.float32)
    b = beta.astype(jnp.float32)
    scale = (g * inv_std).reshape(1, 1, cout)
    shift = (b - mean * g * inv_std).reshape(1, 1, cout)

    # ---- pass 2: affine-only (+ residual) (+ ReLU), bf16 output ------------
    kernel2 = functools.partial(_bn_affine_kernel,
                                has_residual=residual is not None,
                                apply_relu=apply_relu)
    inputs = [y, scale, shift]
    in_specs2 = [
        pl.BlockSpec((pl.Squeezed(), h_out, w_out, cout), lambda n: (n, 0, 0, 0)),
        pl.BlockSpec((1, 1, cout), lambda n: (0, 0, 0)),
        pl.BlockSpec((1, 1, cout), lambda n: (0, 0, 0)),
    ]
    if residual is not None:
        inputs.append(residual.astype(jnp.bfloat16))
        in_specs2.append(pl.BlockSpec((pl.Squeezed(), h_out, w_out, cout),
                                      lambda n: (n, 0, 0, 0)))
    out = pl.pallas_call(
        kernel2,
        grid=(N,),
        in_specs=in_specs2,
        out_specs=pl.BlockSpec((pl.Squeezed(), h_out, w_out, cout),
                               lambda n: (n, 0, 0, 0)),
        out_shape=jax.ShapeDtypeStruct((N, h_out, w_out, cout), jnp.bfloat16),
        compiler_params=cparams,
    )(*inputs)
    return out                                   # (N, Ho, Wo, Cout) bf16


# ---------------------------------------------------------------------------
# ResNet_Block forward (NCHW in / NCHW out, matching the PyTorch module)
# ---------------------------------------------------------------------------
def resnet_block_forward(x_nchw, params, strides):
    x = jnp.transpose(x_nchw, (0, 2, 3, 1)).astype(jnp.bfloat16)   # NHWC bf16

    if params["id_w"] is not None:
        shortcut = conv2d_bn(x, params["id_w"], params["id_gamma"],
                             params["id_beta"], stride=strides, padding=0)
    else:
        # PyTorch only builds the 1x1 shortcut when in_chs != out_chs;
        # the identity path only shape-checks for strides == 1.
        assert strides == 1, "identity shortcut requires strides == 1"
        shortcut = x

    h = conv2d_bn(x, params["w1"], params["g1"], params["b1"],
                  stride=strides, padding=1, apply_relu=True)
    out = conv2d_bn(h, params["w2"], params["g2"], params["b2"],
                    stride=1, padding=1, residual=shortcut, apply_relu=True)
    return jnp.transpose(out, (0, 3, 1, 2)).astype(jnp.float32)


# ---------------------------------------------------------------------------
# Pure-JAX reference (sanity check only, full f32 precision)
# ---------------------------------------------------------------------------
def reference_forward(x, params, strides):
    def conv(a, w, s, p):
        return lax.conv_general_dilated(
            a, w, (s, s), [(p, p), (p, p)],
            dimension_numbers=("NCHW", "OIHW", "NCHW"),
            precision=lax.Precision.HIGHEST)

    def bn(y, g, b):
        mean = y.mean(axis=(0, 2, 3), keepdims=True)
        var = jnp.square(y - mean).mean(axis=(0, 2, 3), keepdims=True)
        return (g.reshape(1, -1, 1, 1) * (y - mean) * lax.rsqrt(var + BN_EPS)
                + b.reshape(1, -1, 1, 1))

    out = jax.nn.relu(bn(conv(x, params["w1"], strides, 1), params["g1"], params["b1"]))
    out = bn(conv(out, params["w2"], 1, 1), params["g2"], params["b2"])
    if params["id_w"] is not None:
        sc = bn(conv(x, params["id_w"], strides, 0),
                params["id_gamma"], params["id_beta"])
    else:
        sc = x
    return jax.nn.relu(sc + out)


# ---------------------------------------------------------------------------
if __name__ == "__main__":
    key = jax.random.PRNGKey(0)

    def make_params(k, in_chs, out_chs, with_id):
        k1, k2, k3 = jax.random.split(k, 3)
        p = {
            "w1": jax.random.normal(k1, (out_chs, in_chs, 3, 3), jnp.float32) * 0.1,
            "g1": jnp.ones((out_chs,), jnp.float32),
            "b1": jnp.zeros((out_chs,), jnp.float32),
            "w2": jax.random.normal(k2, (out_chs, out_chs, 3, 3), jnp.float32) * 0.1,
            "g2": jnp.ones((out_chs,), jnp.float32),
            "b2": jnp.zeros((out_chs,), jnp.float32),
            "id_w": None, "id_gamma": None, "id_beta": None,
        }
        if with_id:
            p["id_w"] = jax.random.normal(k3, (out_chs, in_chs, 1, 1),
                                          jnp.float32) * 0.1
            p["id_gamma"] = jnp.ones((out_chs,), jnp.float32)
            p["id_beta"] = jnp.zeros((out_chs,), jnp.float32)
        return p

    # case 1: down-sampling block (stride-2 3x3 conv + 1x1 id_mapping branch)
    kx, kp, key = jax.random.split(key, 3)
    in_chs, out_chs, strides = 4, 8, 2
    N, H, W = 2, 16, 16
    x = jax.random.normal(kx, (N, in_chs, H, W), jnp.float32)
    params = make_params(kp, in_chs, out_chs, with_id=True)

    out = jax.block_until_ready(resnet_block_forward(x, params, strides))
    assert out.shape == (N, out_chs, H // strides, W // strides), out.shape
    ref = jax.block_until_ready(reference_forward(x, params, strides))
    # bf16 MXU operands / bf16 intermediates (f32 accumulation) -> loose tol
    assert jnp.allclose(out, ref, atol=2e-2, rtol=2e-2), \
        float(jnp.max(jnp.abs(out - ref)))

    # case 2: identity-shortcut block (in_chs == out_chs, stride 1)
    kx2, kp2, key = jax.random.split(key, 3)
    x2 = jax.random.normal(kx2, (2, 8, 16, 16), jnp.float32)
    params2 = make_params(kp2, 8, 8, with_id=False)
    out2 = jax.block_until_ready(resnet_block_forward(x2, params2, 1))
    assert out2.shape == (2, 8, 16, 16), out2.shape
    ref2 = jax.block_until_ready(reference_forward(x2, params2, 1))
    assert jnp.allclose(out2, ref2, atol=2e-2, rtol=2e-2), \
        float(jnp.max(jnp.abs(out2 - ref2)))

    print("KERNEL_OK")
</pallas_src>

<mosaic_0001>
module attributes {stable_mosaic.version = 11 : i64} {
  func.func @_conv_stats_kernel(%arg0: i32, %arg1: memref<1x8x8x4xbf16, #tpu.memory_space<vmem>>, %arg2: memref<1x4x8xbf16, #tpu.memory_space<vmem>>, %arg3: memref<1x8x8x8xbf16, #tpu.memory_space<vmem>>, %arg4: memref<1x1x8xf32, #tpu.memory_space<vmem>>, %arg5: memref<1x1x8xf32, #tpu.memory_space<vmem>>) attributes {dimension_semantics = [#tpu.dimension_semantics<parallel>], iteration_bounds = array<i64: 2>, scalar_prefetch = 0 : i64, scratch_operands = 0 : i64, tpu.core_type = #tpu.core_type<tc>, window_params = [{transform_indices = @transform_0, window_bounds = array<i64: 1, 8, 8, 4>}, {pipeline_mode = #tpu.pipeline_mode<synchronous>, transform_indices = @transform_1, window_bounds = array<i64: 1, 4, 8>}, {transform_indices = @transform_2, window_bounds = array<i64: 1, 8, 8, 8>}, {transform_indices = @transform_3, window_bounds = array<i64: 1, 1, 8>}, {transform_indices = @transform_4, window_bounds = array<i64: 1, 1, 8>}]} {
    %cst = arith.constant 0.000000e+00 : f32
    %0 = vector.broadcast %cst : f32 to vector<1x8xf32>
    %c0 = arith.constant 0 : index
    %c0_0 = arith.constant 0 : index
    %c0_1 = arith.constant 0 : index
    %1 = vector.load %arg4[%c0, %c0_0, %c0_1] : memref<1x1x8xf32, #tpu.memory_space<vmem>>, vector<1x1x8xf32>
    %2 = vector.shape_cast %1 : vector<1x1x8xf32> to vector<1x8xf32>
    %3 = vector.shape_cast %0 : vector<1x8xf32> to vector<1x1x8xf32>
    tpu.vector_store %arg4[%c0, %c0_0, %c0_1], %3 {strides = array<i32>} : memref<1x1x8xf32, #tpu.memory_space<vmem>>, vector<1x1x8xf32>,
    %cst_2 = arith.constant 0.000000e+00 : f32
    %4 = vector.broadcast %cst_2 : f32 to vector<1x8xf32>
    %c0_3 = arith.constant 0 : index
    %c0_4 = arith.constant 0 : index
    %c0_5 = arith.constant 0 : index
    %5 = vector.load %arg5[%c0_3, %c0_4, %c0_5] : memref<1x1x8xf32, #tpu.memory_space<vmem>>, vector<1x1x8xf32>
    %6 = vector.shape_cast %5 : vector<1x1x8xf32> to vector<1x8xf32>
    %7 = vector.shape_cast %4 : vector<1x8xf32> to vector<1x1x8xf32>
    tpu.vector_store %arg5[%c0_3, %c0_4, %c0_5], %7 {strides = array<i32>} : memref<1x1x8xf32, #tpu.memory_space<vmem>>, vector<1x1x8xf32>,
    %c0_i32 = arith.constant 0 : i32
    %c8_i32 = arith.constant 8 : i32
    %8 = arith.addi %c0_i32, %c8_i32 : i32
    %c1_i32 = arith.constant 1 : i32
    scf.for %arg6 = %c0_i32 to %8 step %c1_i32  : i32 {
      %cst_7 = arith.constant 0.000000e+00 : f32
      %9 = vector.broadcast %cst_7 : f32 to vector<8x8xf32>
      %c1_i32_8 = arith.constant 1 : i32
      %10 = arith.muli %arg6, %c1_i32_8 : i32
      %c0_i32_9 = arith.constant 0 : i32
      %11 = arith.addi %10, %c0_i32_9 : i32
      %c0_10 = arith.constant 0 : index
      %12 = arith.index_cast %11 : i32 to index
      %c0_11 = arith.constant 0 : index
      %c0_12 = arith.constant 0 : index
      %13 = vector.load %arg1[%c0_10, %12, %c0_11, %c0_12] : memref<1x8x8x4xbf16, #tpu.memory_space<vmem>>, vector<1x1x8x4xbf16>
      %14 = vector.shape_cast %13 : vector<1x1x8x4xbf16> to vector<8x4xbf16>
      %c0_13 = arith.constant 0 : index
      %c0_14 = arith.constant 0 : index
      %c0_15 = arith.constant 0 : index
      %15 = vector.load %arg2[%c0_13, %c0_14, %c0_15] : memref<1x4x8xbf16, #tpu.memory_space<vmem>>, vector<1x4x8xbf16>
      %16 = vector.shape_cast %15 : vector<1x4x8xbf16> to vector<4x8xbf16>
      %cst_16 = arith.constant dense<0.000000e+00> : vector<8x8xf32>
      %17 = tpu.matmul %14, %16, %cst_16 {dimension_numbers = #tpu.dot_dimension_numbers<[1], [0], [0], [1], [0, 0, 1, 1], [], []>} : vector<8x4xbf16>, vector<4x8xbf16>, vector<8x8xf32> -> vector<8x8xf32>
      %18 = arith.addf %9, %17 : vector<8x8xf32>
      %19 = arith.truncf %18 : vector<8x8xf32> to vector<8x8xbf16>
      %c0_17 = arith.constant 0 : index
      %20 = arith.index_cast %arg6 : i32 to index
      %c0_18 = arith.constant 0 : index
      %c0_19 = arith.constant 0 : index
      %21 = vector.load %arg3[%c0_17, %20, %c0_18, %c0_19] : memref<1x8x8x8xbf16, #tpu.memory_space<vmem>>, vector<1x1x8x8xbf16>
      %22 = vector.shape_cast %21 : vector<1x1x8x8xbf16> to vector<8x8xbf16>
      %23 = vector.shape_cast %19 : vector<8x8xbf16> to vector<1x1x8x8xbf16>
      tpu.vector_store %arg3[%c0_17, %20, %c0_18, %c0_19], %23 {strides = array<i32>} : memref<1x8x8x8xbf16, #tpu.memory_space<vmem>>, vector<1x1x8x8xbf16>,
      %c0_20 = arith.constant 0 : index
      %c0_21 = arith.constant 0 : index
      %c0_22 = arith.constant 0 : index
      %24 = vector.load %arg4[%c0_20, %c0_21, %c0_22] : memref<1x1x8xf32, #tpu.memory_space<vmem>>, vector<1x1x8xf32>
      %25 = vector.shape_cast %24 : vector<1x1x8xf32> to vector<1x8xf32>
      %cst_23 = arith.constant dense<0.000000e+00> : vector<8xf32>
      %26 = vector.multi_reduction <add>, %18, %cst_23 [0] : vector<8x8xf32> to vector<8xf32>
      %27 = vector.shape_cast %26 : vector<8xf32> to vector<1x8xf32>
      %28 = arith.addf %25, %27 : vector<1x8xf32>
      %c0_24 = arith.constant 0 : index
      %c0_25 = arith.constant 0 : index
      %c0_26 = arith.constant 0 : index
      %29 = vector.load %arg4[%c0_24, %c0_25, %c0_26] : memref<1x1x8xf32, #tpu.memory_space<vmem>>, vector<1x1x8xf32>
      %30 = vector.shape_cast %29 : vector<1x1x8xf32> to vector<1x8xf32>
      %31 = vector.shape_cast %28 : vector<1x8xf32> to vector<1x1x8xf32>
      tpu.vector_store %arg4[%c0_24, %c0_25, %c0_26], %31 {strides = array<i32>} : memref<1x1x8xf32, #tpu.memory_space<vmem>>, vector<1x1x8xf32>,
      %c0_27 = arith.constant 0 : index
      %c0_28 = arith.constant 0 : index
      %c0_29 = arith.constant 0 : index
      %32 = vector.load %arg5[%c0_27, %c0_28, %c0_29] : memref<1x1x8xf32, #tpu.memory_space<vmem>>, vector<1x1x8xf32>
      %33 = vector.shape_cast %32 : vector<1x1x8xf32> to vector<1x8xf32>
      %34 = arith.mulf %18, %18 : vector<8x8xf32>
      %cst_30 = arith.constant dense<0.000000e+00> : vector<8xf32>
      %35 = vector.multi_reduction <add>, %34, %cst_30 [0] : vector<8x8xf32> to vector<8xf32>
      %36 = vector.shape_cast %35 : vector<8xf32> to vector<1x8xf32>
      %37 = arith.addf %33, %36 : vector<1x8xf32>
      %c0_31 = arith.constant 0 : index
      %c0_32 = arith.constant 0 : index
      %c0_33 = arith.constant 0 : index
      %38 = vector.load %arg5[%c0_31, %c0_32, %c0_33] : memref<1x1x8xf32, #tpu.memory_space<vmem>>, vector<1x1x8xf32>
      %39 = vector.shape_cast %38 : vector<1x1x8xf32> to vector<1x8xf32>
      %40 = vector.shape_cast %37 : vector<1x8xf32> to vector<1x1x8xf32>
      tpu.vector_store %arg5[%c0_31, %c0_32, %c0_33], %40 {strides = array<i32>} : memref<1x1x8xf32, #tpu.memory_space<vmem>>, vector<1x1x8xf32>,
    }
    %c8_i32_6 = arith.constant 8 : i32
    return
  }
  func.func @transform_0(%arg0: i32) -> (i32, i32, i32, i32) {
    %c0_i32 = arith.constant 0 : i32
    %c0_i32_0 = arith.constant 0 : i32
    %c0_i32_1 = arith.constant 0 : i32
    %c0_i32_2 = arith.constant 0 : i32
    return %arg0, %c0_i32, %c0_i32_0, %c0_i32_1 : i32, i32, i32, i32
  }
  func.func @transform_1(%arg0: i32) -> (i32, i32, i32) {
    %c0_i32 = arith.constant 0 : i32
    %c0_i32_0 = arith.constant 0 : i32
    %c0_i32_1 = arith.constant 0 : i32
    %c0_i32_2 = arith.constant 0 : i32
    return %c0_i32, %c0_i32_0, %c0_i32_1 : i32, i32, i32
  }
  func.func @transform_2(%arg0: i32) -> (i32, i32, i32, i32) {
    %c0_i32 = arith.constant 0 : i32
    %c0_i32_0 = arith.constant 0 : i32
    %c0_i32_1 = arith.constant 0 : i32
    %c0_i32_2 = arith.constant 0 : i32
    return %arg0, %c0_i32, %c0_i32_0, %c0_i32_1 : i32, i32, i32, i32
  }
  func.func @transform_3(%arg0: i32) -> (i32, i32, i32) {
    %c0_i32 = arith.constant 0 : i32
    %c0_i32_0 = arith.constant 0 : i32
    %c0_i32_1 = arith.constant 0 : i32
    return %arg0, %c0_i32, %c0_i32_0 : i32, i32, i32
  }
  func.func @transform_4(%arg0: i32) -> (i32, i32, i32) {
    %c0_i32 = arith.constant 0 : i32
    %c0_i32_0 = arith.constant 0 : i32
    %c0_i32_1 = arith.constant 0 : i32
    return %arg0, %c0_i32, %c0_i32_0 : i32, i32, i32
  }
}

</mosaic_0001>

<bundles_post_ra>
// kernel: tpu_custom_call.1
= control target key start
LH: loop header
LB: loop body
LE: loop exit
PB: predicated region body
PF: predicated region fallthrough
CT: control target
= control target key end

     0   :  { %10 = vsyncpa [#allocation3], 0  ;;  %s848_s0 = inlined_call_operand.vmem [shape: bf16[2,8,8,4], index: 0, kind: input, shape index: {}]   ;;  %s849_s1 = inlined_call_operand.vmem [shape: bf16[1,4,8], index: 1, kind: input, shape index: {}]   ;;  %s850_s2 = inlined_call_operand.hbm [shape: bf16[2,8,8,8], index: 2, kind: output, shape index: {0}]   ;;  %s851_s3 = inlined_call_operand.hbm [shape: f32[2,1,8], index: 3, kind: output, shape index: {1}]   ;;  %s852_s4 = inlined_call_operand.hbm [shape: f32[2,1,8], index: 4, kind: output, shape index: {2}]  }
   0x1   :  { %12 = vsyncpa [#allocation3 + $0x1], 0 }
   0x2   :  { %13 = vsyncpa [#allocation5], 0 }
   0x3   :  { %15 = vsyncpa [#allocation5 + $0x1], 0  ;;  %s685_s15 = smov 0   ;;  %s687_s16 = smov 0  }
   0x4   :  { %s689_s17 = smov 0   ;;  %s691_s18 = smov 0  }
   0x5 LB: > { %s706_s19 = sadd.s32 4294967295, %s651_s18   ;;  %s853_s20 = sadd.s32 4294967294, %s651_s18   ;;  %s651_s18 = sphi %s691_s18, %s860_s18   ;;  %s647_s17 = sphi %s689_s17, %s859_s17   ;;  %s643_s16 = sphi %s687_s16, %s858_s16   ;;  %s639_s15 = sphi %s685_s15, %s857_s15  }
   0x6   : > { %s710_s21 = sadd.s32 1, %s651_s18   ;;  %s75_s22 = sadd.s32 1, %s647_s17 }
   0x7   : > { %s72_s23 = ssub.s32 %s651_s18, %s710_s21  ;;  %p85_p0 = scmp.ne.s32.totalorder %s647_s17, %s643_s16 }
   0x8   : > { %p73_p1 = scmp.eq.s32.totalorder %s72_s23, 0  ;;  %p86_p2 = scmp.eq.s32.totalorder %s706_s19, 1 }
   0x9   : > { %p91_p3 = scmp.ne.s32.totalorder %s643_s16, %s639_s15  ;;  %p92_p4 = scmp.eq.s32.totalorder %s853_s20, 1 }
   0xa   : > { %s723_s24 = scalar_select %p73_p1, %s647_s17, %s75_s22  }
   0xb   : > { %p725_p5 = por %p86_p2, %p85_p0  ;;  %p729_p6 = por %p92_p4, %p91_p3 }
   0xc   : > { %p451_p7 = scmp.ge.s32.totalorder %s651_s18, 1  ;;  %p173_p8 = scmp.lt.s32.totalorder %s651_s18, 3 }
   0xe   : > { %p174_p9 = pnand %p451_p7, %p173_p8 }
   0xf   : > { %s736_s27 = sand.u32 (!%p174_p9), 1, %s643_s16   ;;  %p207_p10 = scmp.lt.s32.totalorder (!%p174_p9), %s706_s19, 1 }
  0x10   : > { %177 = sbr.rel (%p174_p9) target bundleno = 206 (0xce), region = 28  ;;  %s452_s28 = sshll.u32 (!%p174_p9), %s736_s27, 5 }
  0x11   : > { %s741_s29 = scalar_lea.vmem (!%p174_p9), [#allocation4], %s736_s27  ;;  %s747_s5 = scalar_lea.vmem (!%p174_p9), [#allocation6], %s736_s27 }
  0x12   : > { %s756_s10 = scalar_lea.vmem (!%p174_p9), [#allocation2], %s452_s28  ;;  %s758_s11 = smov (!%p174_p9), 0  }
  0x15   : > { %vm213_vm0 = vcmask 57344   ;;  %v657_v0 = vmov 0.0   ;;  %s208_s30 = scalar_select %p207_p10, %s706_s19, 1 }
  0x16   : > { %214 = vst.msk [vmem:[%s741_s29] sm:$0x1] %vm213_vm0, %v657_v0 }
  0x17   : > { %215 = vst.msk [vmem:[%s747_s5] sm:$0x1] %vm213_vm0, %v657_v0  ;;  %s463_s6 = sshll.u32 %s208_s30, 5 }
  0x18   : > { %s754_s9 = scalar_lea.vmem %s848_s0, %s463_s6 }
  0x19 LB: >> { %v225_v1 = vld [vmem:[%s849_s1] sm:$0x3]  ;;  %vm230_vm1 = vcmask 1041408   ;;  %s455_s14 = sshll.u32 %s655_s11, 2  ;;  %vm226_vm2 = vcmask 31744   ;;  %vm253_vm3 = vcmask 64512   ;;  %s655_s11 = sphi %s758_s11, %s221_s11  }
  0x1a   : >> { %v232_v2 = vsel %vm230_vm1, %v225_v1, 0  ;;  %s223_s22 = scalar_lea.vmem %s754_s9, %s455_s14  ;;  %s249_s23 = scalar_lea.vmem %s756_s10, %s455_s14 [#allocation2]  ;;  %vm250_vm4 = vcmask 60416  }
  0x1b   : >> { %241 = vmatpush.bf16.msra.mxu0 %v232_v2  ;;  %v224_v3 = vld [vmem:[%s223_s22] sm:$0xf]  ;;  %s221_s11 = sadd.s32 1, %s655_s11  }
  0x1c   : >> { %p218_p11 = scmp.ge.s32.totalorder %s221_s11, 8  }
  0x1d   : >> { %v252_v19 = vld [vmem:[%s741_s29] sm:$0x1]  ;;  %s279_s28 = sand.u32 (%p218_p11), 1, %s706_s19   ;;  %s309_s7 = scalar_lea.hbm (%p218_p11), %s851_s3, %s706_s19 }
  0x1e   : >> { %456 = vmatmul.msk.bf16.vlgmr.msra.gmra.mxu0 %vm226_vm2, %v224_v3  ;;  %v263_v22 = vld [vmem:[%s747_s5] sm:$0x1]  ;;  %s311_s8 = sshll.u32 (%p218_p11), %s741_s29, 4  ;;  %s313_s12 = sshll.u32 (%p218_p11), %s309_s7, 4  ;;  %s312_s8 = int_to_ptr.vmem [resolvable:$true] %s311_s8  ;;  %s314_s12 = int_to_ptr.hbm [resolvable:$true] %s313_s12 }
  0x1f   : > { %s784_s13 = scalar_lea.sflag (%p218_p11), [#allocation5], %s279_s28  ;;  %s539_s14 = sshra.s32 (%p218_p11), %s314_s12, 4  ;;  %s540_s14 = int_to_ptr.hbm [resolvable:$true] %s539_s14 }
  0x20   : > { %s541_s22 = scalar_lea.hbm (%p218_p11), %s540_s14, 1  ;;  %p546_p1 = scmp.lt.s32.totalorder (%p218_p11), %s540_s14, %s851_s3 }
  0x21   : > { %p542_p12 = scmp.ne.s32.totalorder (%p218_p11), %s540_s14, %s541_s22 }
  0x23   : > { %p543_p13 = pnand (%p218_p11), %p542_p12, %p725_p5 }
  0x25   : > { %p544_p0 = pneg (%p218_p11), %p543_p13 }
  0x9b   : >> { %v243_v4 = vpop.f32.mrf.mxu0 }
  0x9c   : >> { %v247_v5 = vpack.c.bf16 %v243_v4, %v243_v4  ;;  %v254_v6 = vsel %vm253_vm3, %v243_v4, 0.0  ;;  %v264_v7 = vmul.f32 %v243_v4, %v243_v4 }
  0x9d   : >> { %v255_v8 = vrot.slane %v254_v6, 4 }
  0x9e   : >> { %251 = vst.msk [vmem:[%s249_s23] sm:$0xf] %vm250_vm4, %v247_v5  ;;  %v265_v9 = vsel %vm253_vm3, %v264_v7, 0.0  ;;  %s545_s23 = scalar_lea.hbm (%p218_p11), %s851_s3, 2 }
  0x9f   : >> { %v256_v10 = vadd.f32 %v255_v8, %v254_v6  ;;  %v266_v11 = vrot.slane %v265_v9, 4  ;;  %p547_p2 = scmp.lt.s32.totalorder (%p218_p11), %s545_s23, %s541_s22 }
  0xa1   : >> { %v257_v12 = vrot.slane %v256_v10, 2  ;;  %v267_v13 = vadd.f32 %v266_v11, %v265_v9  ;;  %p548_p3 = por (%p218_p11), %p547_p2, %p546_p1 }
  0xa3   : >> { %v258_v14 = vadd.f32 %v257_v12, %v256_v10  ;;  %v268_v15 = vrot.slane %v267_v13, 2  ;;  %v245_v16 = vpop.f32.mrf.mxu0  ;;  %p549_p4 = pnand (%p218_p11), %p548_p3, %p544_p0 }
  0xa5   : >> { %v259_v17 = vrot.slane %v258_v14, 1  ;;  %v269_v18 = vadd.f32 %v268_v15, %v267_v13 }
  0xa7   : >> { %v260_v20 = vadd.f32 %v259_v17, %v258_v14  ;;  %v270_v21 = vrot.slane %v269_v18, 1 }
  0xa9   : >> { %v261_v23 = vadd.f32 %v260_v20, %v252_v19  ;;  %v271_v24 = vadd.f32 %v270_v21, %v269_v18  ;;  %220 = sbr.rel (!%p218_p11) target bundleno = 25 (0x19), region = 104 }
  0xab   : >> { %262 = vst.msk [vmem:[%s741_s29] sm:$0x1] %vm213_vm0, %v261_v23  ;;  %v272_v25 = vadd.f32 %v271_v24, %v263_v22 }
  0xad   : >> { %273 = vst.msk [vmem:[%s747_s5] sm:$0x1] %vm213_vm0, %v272_v25 }
  0xae   : > { %552 = shalt.err (!%p549_p4)
}
  0xaf   : > { %466 = dma.vmem_to_hbm [thread:$0]  (%p725_p5), %s312_s8, 16, %s314_s12, %s784_s13  }
  0xb0   : > { %s464_s29 = sshll.u32 %s706_s19, 5  ;;  %s295_s28 = sshll.u32 %s756_s10, 4  ;;  %s296_s28 = int_to_ptr.vmem [resolvable:$true] %s295_s28 }
  0xb1   : > { %s294_s9 = scalar_lea.hbm %s850_s2, %s464_s29  ;;  %s275_s14 = scalar_lea.sflag [#allocation3], %s736_s27 }
  0xb2   : > { %s297_s20 = sshll.u32 %s294_s9, 4  ;;  %s573_s8 = scalar_lea.hbm %s850_s2, 64  ;;  %s298_s20 = int_to_ptr.hbm [resolvable:$true] %s297_s20 }
  0xb3   : > { %s567_s22 = sshra.s32 %s298_s20, 4  ;;  %s568_s22 = int_to_ptr.hbm [resolvable:$true] %s567_s22 }
  0xb4   : > { %s569_s11 = scalar_lea.hbm %s568_s22, 32  ;;  %p574_p10 = scmp.lt.s32.totalorder %s568_s22, %s850_s2 }
  0xb5   : > { %p570_p7 = scmp.ne.s32.totalorder %s568_s22, %s569_s11  ;;  %p575_p11 = scmp.lt.s32.totalorder %s573_s8, %s569_s11 }
  0xb7   : > { %p571_p8 = pnand %p570_p7, %p725_p5  ;;  %p576_p12 = por %p575_p11, %p574_p10 }
  0xb9   : > { %p572_p9 = pneg %p571_p8 }
  0xbb   : > { %p577_p13 = pnand %p576_p12, %p572_p9 }
  0xbd   : > { %580 = shalt.err (!%p577_p13)
}
  0xbe   : > { %s658_s27 = smov 64   ;;  %s659_s29 = smov 4  }
  0xbf   : > { %465 = dma.vmem_to_hbm [thread:$0]  (%p725_p5), %s296_s28, 512, %s298_s20, %s275_s14, %s658_s27, %s658_s27, %s659_s29  }
  0xc0   : > { %s322_s9 = scalar_lea.hbm %s852_s4, %s706_s19  ;;  %s324_s23 = sshll.u32 %s747_s5, 4  ;;  %s325_s23 = int_to_ptr.vmem [resolvable:$true] %s324_s23 }
  0xc1   : > { %s326_s30 = sshll.u32 %s322_s9, 4  ;;  %s601_s12 = scalar_lea.hbm %s852_s4, 2  ;;  %s327_s30 = int_to_ptr.hbm [resolvable:$true] %s326_s30 }
  0xc2   : > { %s595_s22 = sshra.s32 %s327_s30, 4  ;;  %s596_s22 = int_to_ptr.hbm [resolvable:$true] %s595_s22 }
  0xc3   : > { %s597_s11 = scalar_lea.hbm %s596_s22, 1  ;;  %p602_p3 = scmp.lt.s32.totalorder %s596_s22, %s852_s4 }
  0xc4   : > { %p598_p0 = scmp.ne.s32.totalorder %s596_s22, %s597_s11  ;;  %p603_p4 = scmp.lt.s32.totalorder %s601_s12, %s597_s11 }
  0xc6   : > { %p599_p1 = pnand %p598_p0, %p725_p5  ;;  %p604_p7 = por %p603_p4, %p602_p3 }
  0xc8   : > { %p600_p2 = pneg %p599_p1 }
  0xca   : > { %p605_p8 = pnand %p604_p7, %p600_p2 }
  0xcc   : > { %608 = shalt.err (!%p605_p8)
}
  0xcd   : > { %467 = dma.vmem_to_hbm [thread:$0]  (%p725_p5), %s325_s23, 16, %s327_s30, %s784_s13  }
  0xce PF: > { %p481_p9 = scmp.ge.s32.totalorder %s651_s18, 2  ;;  %s338_s19 = sand.u32 1, %s639_s15  }
  0xcf   : > { %s339_s5 = scalar_lea.sflag [#allocation3], %s338_s19 }
  0xd0   : > { %p472_p10 = pnand %p481_p9, %p729_p6 }
  0xd2   : > { %p473_p11 = pneg %p472_p10 }
  0xd4   : > { %630 = dma.done.wait (%p473_p11), %s339_s5, 512  }
  0xd5   : > { %632 = vsyncadd (%p473_p11), %s339_s5, 4294966784  ;;  %s856_s14 = sadd.s32 4294967294, %s651_s18  }
  0xd6   : > { %s348_s27 = sand.u32 1, %s856_s14  }
  0xd7   : > { %s349_s29 = scalar_lea.sflag [#allocation5], %s348_s27 }
  0xd8   : > { %634 = dma.done.wait (%p473_p11), %s349_s29, 32  }
  0xd9   : > { %636 = vsyncadd (%p473_p11), %s349_s29, 4294967264  ;;  %p18_p5 = scmp.ge.s32.totalorder %s710_s21, 4   ;;  %s857_s15 = smov %s643_s16 }
  0xda   : > { %s858_s16 = smov %s647_s17  ;;  %s859_s17 = smov %s723_s24 }
  0xdb   : > { %s860_s18 = smov %s710_s21  ;;  %20 = sbr.rel (!%p18_p5) target bundleno = 5 (0x5), region = 115 }
  0xe0   :  { %363 = vsyncpa [#allocation3], 1 }
  0xe1   :  { %365 = vsyncpa [#allocation3 + $0x1], 1 }
  0xe2   :  { %366 = vsyncpa [#allocation5], 1 }
  0xe3   :  { %368 = vsyncpa [#allocation5 + $0x1], 1 }

</bundles_post_ra>
